<compile_context>
chip_gen: v6e
topology: v6e:2x2x1
jax: 0.10.0
libtpu: 0.0.40
codegen_flags: <defaults>
</compile_context>

<pallas_src>
import jax
import jax.numpy as jnp
from jax import lax
from jax.experimental import pallas as pl
from jax.experimental.pallas import tpu as pltpu

_MIB = 1024 * 1024


def _actor_kernel(x_ref, w_ref, b_ref, o_ref):
    # x_ref: (tm, D), w_ref: (A, D), b_ref: (1, A), o_ref: (tm, A)
    # Contract on D (dim 1 of both operands) -> (tm, A); no transpose needed,
    # the MXU handles the transposed operand natively.
    acc = lax.dot_general(
        x_ref[...], w_ref[...],
        dimension_numbers=(((1,), (1,)), ((), ())),
        preferred_element_type=jnp.float32,
    )
    o_ref[...] = (acc + b_ref[...]).astype(o_ref.dtype)


def _vmem_budget_bytes():
    """Scoped-VMEM limit to request: ~half of this chip's physical VMEM.

    v5e/v6e: 128 MiB phys -> 64 MiB budget; v7x: 64 MiB phys -> 32 MiB budget.
    Falls back to the most conservative (v7x) figure if the query fails.
    """
    try:
        phys = int(pltpu.get_tpu_info().vmem_capacity_bytes)
    except Exception:
        phys = 64 * _MIB
    return max(16 * _MIB, phys // 2)


def _pick_batch_tile(D, A, budget_bytes, cap=32768):
    """Largest sublane-aligned batch tile whose double-buffered x + out tiles
    fit in ~75% of the scoped VMEM budget (weight/bias are tiny and resident)."""
    bytes_per_row = 2 * 4 * (D + A)  # 2 pipeline buffers x f32 x (in + out cols)
    tm = int(budget_bytes * 0.75) // bytes_per_row
    tm = min(tm, cap)
    tm = max((tm // 8) * 8, 8)  # sublane (8) aligned
    return tm


def actor_forward(x, weight, bias):
    """x: (B, input_dim) f32; weight: (num_actions, input_dim); bias: (num_actions,)."""
    B, D = x.shape
    A, Dw = weight.shape
    assert D == Dw, "weight/input dim mismatch"
    b2 = bias.reshape(1, A)  # 2D (1, A) for TPU-friendly broadcast

    budget = _vmem_budget_bytes()
    tm = _pick_batch_tile(D, A, budget)

    if B <= tm:
        # Single-block path: whole problem resident in VMEM for one kernel
        # invocation — no grid, no pipeline prologue/epilogue, no double
        # buffering.  Covers everything up to tens of thousands of rows.
        return pl.pallas_call(
            _actor_kernel,
            out_shape=jax.ShapeDtypeStruct((B, A), x.dtype),
            in_specs=[
                pl.BlockSpec(memory_space=pltpu.MemorySpace.VMEM),  # x
                pl.BlockSpec(memory_space=pltpu.MemorySpace.VMEM),  # weight
                pl.BlockSpec(memory_space=pltpu.MemorySpace.VMEM),  # bias
            ],
            out_specs=pl.BlockSpec(memory_space=pltpu.MemorySpace.VMEM),
            compiler_params=pltpu.CompilerParams(vmem_limit_bytes=budget),
        )(x, weight, b2)

    # Large-batch path: tile only the batch axis with a VMEM-sized tile and a
    # cdiv grid (last partial block is masked by Pallas).  Weight & bias have
    # constant index_maps so they are fetched once and stay resident.
    return pl.pallas_call(
        _actor_kernel,
        out_shape=jax.ShapeDtypeStruct((B, A), x.dtype),
        grid=(pl.cdiv(B, tm),),
        in_specs=[
            pl.BlockSpec((tm, D), lambda i: (i, 0)),   # x: batch-tiled stream
            pl.BlockSpec((A, D), lambda i: (0, 0)),    # weight: resident
            pl.BlockSpec((1, A), lambda i: (0, 0)),    # bias: resident
        ],
        out_specs=pl.BlockSpec((tm, A), lambda i: (i, 0)),
        compiler_params=pltpu.CompilerParams(
            # Batch blocks are independent.  (Plain "parallel" does not shard
            # across v7x's two TensorCores; see CORE_PARALLEL TODO above.)
            dimension_semantics=("parallel",),
            vmem_limit_bytes=budget,
        ),
    )(x, weight, b2)


if __name__ == "__main__":
    key = jax.random.PRNGKey(0)
    batch, input_dim, num_actions = 8, 32, 8

    kx, kw, kb = jax.random.split(key, 3)
    x = jax.random.normal(kx, (batch, input_dim), dtype=jnp.float32)

    # 1) Random params at small shapes: validates matmul / bias plumbing.
    weight = jax.random.normal(kw, (num_actions, input_dim), dtype=jnp.float32)
    bias = jax.random.normal(kb, (num_actions,), dtype=jnp.float32)
    logits = actor_forward(x, weight, bias)
    jax.block_until_ready(logits)
    ref = x @ weight.T + bias
    assert logits.shape == (batch, num_actions)
    assert jnp.allclose(logits, ref, atol=1e-3, rtol=1e-3), "mismatch vs reference (random params)"

    # 2) Zero-init params: matches Actor._initialize_weights (module semantics).
    w0 = jnp.zeros((num_actions, input_dim), dtype=jnp.float32)
    b0 = jnp.zeros((num_actions,), dtype=jnp.float32)
    logits0 = actor_forward(x, w0, b0)
    jax.block_until_ready(logits0)
    assert jnp.allclose(logits0, jnp.zeros((batch, num_actions), jnp.float32)), "zero-init mismatch"

    # 3) Exercise the tiled cdiv-grid path (B > tm, partial last block).
    B_big = 100_000  # > 32768-row tile cap -> multi-block grid with a partial tail
    xb = jax.random.normal(kx, (B_big, input_dim), dtype=jnp.float32)
    logits_big = actor_forward(xb, weight, bias)
    jax.block_until_ready(logits_big)
    ref_big = xb @ weight.T + bias
    assert logits_big.shape == (B_big, num_actions)
    assert jnp.allclose(logits_big, ref_big, atol=1e-3, rtol=1e-3), "mismatch vs reference (tiled path)"

    print("KERNEL_OK")
</pallas_src>

<mosaic_0001>
module attributes {stable_mosaic.version = 11 : i64} {
  func.func @_actor_kernel(%arg0: memref<8x32xf32, #tpu.memory_space<vmem>>, %arg1: memref<8x32xf32, #tpu.memory_space<vmem>>, %arg2: memref<1x8xf32, #tpu.memory_space<vmem>>, %arg3: memref<8x8xf32, #tpu.memory_space<vmem>>) attributes {dimension_semantics = [], scalar_prefetch = 0 : i64, scratch_operands = 0 : i64, tpu.core_type = #tpu.core_type<tc>} {
    %c0 = arith.constant 0 : index
    %c0_0 = arith.constant 0 : index
    %0 = vector.load %arg0[%c0, %c0_0] : memref<8x32xf32, #tpu.memory_space<vmem>>, vector<8x32xf32>
    %c0_1 = arith.constant 0 : index
    %c0_2 = arith.constant 0 : index
    %1 = vector.load %arg1[%c0_1, %c0_2] : memref<8x32xf32, #tpu.memory_space<vmem>>, vector<8x32xf32>
    %cst = arith.constant dense<0.000000e+00> : vector<8x8xf32>
    %2 = tpu.matmul %0, %1, %cst {dimension_numbers = #tpu.dot_dimension_numbers<[1], [1], [0], [0], [0, 0, 1, 0], [], []>} : vector<8x32xf32>, vector<8x32xf32>, vector<8x8xf32> -> vector<8x8xf32>
    %c0_3 = arith.constant 0 : index
    %c0_4 = arith.constant 0 : index
    %3 = vector.load %arg2[%c0_3, %c0_4] : memref<1x8xf32, #tpu.memory_space<vmem>>, vector<1x8xf32>
    %4 = vector.broadcast %3 : vector<1x8xf32> to vector<8x8xf32>
    %5 = arith.addf %2, %4 : vector<8x8xf32>
    %c0_5 = arith.constant 0 : index
    %c0_6 = arith.constant 0 : index
    %6 = vector.load %arg3[%c0_5, %c0_6] : memref<8x8xf32, #tpu.memory_space<vmem>>, vector<8x8xf32>
    tpu.vector_store %arg3[%c0_5, %c0_6], %5 {strides = array<i32>} : memref<8x8xf32, #tpu.memory_space<vmem>>, vector<8x8xf32>,
    return
  }
}

</mosaic_0001>

<bundles_post_ra>
// kernel: tpu_custom_call.1
= control target key start
LH: loop header
LB: loop body
LE: loop exit
PB: predicated region body
PF: predicated region fallthrough
CT: control target
= control target key end

     0   :  { %8 = vsyncpa [#allocation3], 0  ;;  %s261_s0 = inlined_call_operand.hbm [shape: f32[8,32], index: 0, kind: input, shape index: {}]   ;;  %s262_s1 = inlined_call_operand.hbm [shape: f32[8,32], index: 1, kind: input, shape index: {}]   ;;  %s263_s2 = inlined_call_operand.vmem [shape: f32[1,8], index: 2, kind: input, shape index: {}]   ;;  %s264_s3 = inlined_call_operand.hbm [shape: f32[8,8], index: 3, kind: output, shape index: {}]  }
   0x1   :  { %9 = vsyncpa [#allocation6], 0 }
   0x2   :  { %10 = vsyncpa [#allocation4], 0  ;;  %s224_s12 = smov [#allocation2]   ;;  %s225_s14 = smov [#allocation5]  }
   0x3   :  { %s17_s13 = sshll.u32 %s224_s12, 4  ;;  %s27_s15 = sshll.u32 %s225_s14, 4  ;;  %s18_s13 = int_to_ptr.vmem [resolvable:$true] %s17_s13  ;;  %s28_s15 = int_to_ptr.vmem [resolvable:$true] %s27_s15 }
   0x4   :  { %s166_s16 = scalar_lea.vmem %s18_s13, 128  ;;  %p171_p1 = scmp.lt.s32.totalorder %s18_s13, %s18_s13 }
   0x5   :  { %p167_p0 = scmp.ne.s32.totalorder %s18_s13, %s166_s16  ;;  %p172_p2 = scmp.lt.s32.totalorder %s166_s16, %s166_s16 }
   0x7   :  { %p173_p3 = por %p172_p2, %p171_p1 }
   0x9   :  { %p174_p4 = pnand %p173_p3, %p167_p0 }
   0xb   :  { %177 = shalt.err (!%p174_p4)
}
   0xc   :  { %20 = dma.hbm_to_vmem [thread:$0]  %s261_s0, 128, %s18_s13, [#allocation3]  }
   0xd   :  { %s186_s19 = scalar_lea.vmem %s28_s15, 128  ;;  %p191_p6 = scmp.lt.s32.totalorder %s28_s15, %s28_s15 }
   0xe   :  { %p187_p5 = scmp.ne.s32.totalorder %s28_s15, %s186_s19  ;;  %p192_p7 = scmp.lt.s32.totalorder %s186_s19, %s186_s19 }
  0x10   :  { %p193_p8 = por %p192_p7, %p191_p6 }
  0x12   :  { %p194_p9 = pnand %p193_p8, %p187_p5 }
  0x14   :  { %197 = shalt.err (!%p194_p9)
}
  0x15   :  { %30 = dma.hbm_to_vmem [thread:$0]  %s262_s1, 128, %s28_s15, [#allocation6]  }
  0x16   :  { %218 = dma.done.wait [#allocation3], 128  }
  0x17   :  { %219 = vsyncadd [#allocation3], 4294967168 }
  0x18   :  { %220 = dma.done.wait [#allocation6], 128  }
  0x19   :  { %221 = vsyncadd [#allocation6], 4294967168  ;;  %v226_v0 = vmov 0.0   ;;  %vm227_vm0 = vmmov 0   ;;  %vm48_vm1 = vcmask 261120   ;;  %v40_v1 = vld [vmem:[#allocation5] sm:$0xff] }
  0x1a   :  { %148 = vmatprep.subr.mxu0 %v226_v0  ;;  %150 = vmatprep.mubr.msk.f32.mxu0 %vm227_vm0, %v226_v0  ;;  %v39_v2 = vld [vmem:[#allocation2] sm:$0xff]  ;;  %s228_s23 = smov [#allocation7]   ;;  %vm125_vm2 = vcmask 64512  }
  0x1b   :  { %149 = vmatpush3.xpose.msk.msra.mxu0 %vm48_vm1, %v40_v1  ;;  %v143_v3 = vld [vmem:[%s263_s2] ss:$0 sm:$0xff]  ;;  %s133_s24 = sshll.u32 %s228_s23, 4  ;;  %s134_s24 = int_to_ptr.vmem [resolvable:$true] %s133_s24 }
  0x1c   :  { %s198_s1 = scalar_lea.vmem %s134_s24, 128  ;;  %p203_p11 = scmp.lt.s32.totalorder %s134_s24, %s134_s24 }
  0x1d   :  { %p199_p10 = scmp.ne.s32.totalorder %s134_s24, %s198_s1  ;;  %p204_p12 = scmp.lt.s32.totalorder %s198_s1, %s198_s1 }
  0x1e   :  { %151 = vmatmul.mubr.msk.f32.vlgmr.msra.gmra.mxu0 %vm48_vm1, %v39_v2 }
  0x1f   :  { %p205_p13 = por %p204_p12, %p203_p11 }
  0x21   :  { %p206_p0 = pnand %p205_p13, %p199_p10 }
  0xde   :  { %v121_v4 = vpop.f32.mrf.mxu0 }
  0xdf   :  { %v122_v5 = vadd.f32 %v143_v3, %v121_v4 }
  0xe0   :  { %v152_v6 = vpop.f32.mrf.mxu0 }
  0xe1   :  { %126 = vst.msk [vmem:[#allocation7] sm:$0xff] %vm125_vm2, %v122_v5 }
  0xe2   :  { %209 = shalt.err (!%p206_p0)
}
  0xe3   :  { %136 = dma.vmem_to_hbm [thread:$0]  %s134_s24, 128, %s264_s3, [#allocation4]  }
  0xe4   :  { %222 = dma.done.wait [#allocation4], 128  }
  0xe5   :  { %223 = vsyncadd [#allocation4], 4294967168 }
  0xe6   :  { %140 = vsyncpa [#allocation3], 1 }
  0xe7   :  { %141 = vsyncpa [#allocation6], 1 }
  0xe8   :  { %142 = vsyncpa [#allocation4], 1 }

</bundles_post_ra>
